<compile_context>
chip_gen: v7x
topology: tpu7x:2x2x1
jax: 0.10.0
libtpu: 0.0.40
codegen_flags: <defaults>
</compile_context>

<pallas_src>
import jax
import jax.numpy as jnp
from jax import lax
from jax.experimental import pallas as pl
from jax.experimental.pallas import tpu as pltpu


def se101_head_kernel(x_ref, w_ref, b_ref, o_ref):
    # x_ref: (TB, HW, C)  lane-dense feature tile for TB batch samples
    # w_ref: (NUM_CLASSES, C)  torch nn.Linear weight, lane-dense (C on the 128-lane axis)
    # b_ref: (1, NUM_CLASSES)
    # o_ref: (TB, NUM_CLASSES) this grid step's own output block (f32)
    #
    # AvgPool: F.avg_pool2d(x, x.shape[2:]) == mean over all spatial positions.  f32 accumulation
    # fused into the reduce (no full-tile f32 temp for bf16 inputs).
    pooled = jnp.mean(x_ref[...], axis=1, dtype=jnp.float32)            # (TB, C)
    # Dropout (eval mode) -> identity.
    # Linear: logits = pooled @ W^T + b ; contract the shared C axis (lane axis of both operands).
    w = w_ref[...].astype(jnp.float32)                                   # (NUM_CLASSES, C), tiny
    logits = lax.dot_general(pooled, w, (((1,), (1,)), ((), ())),
                             preferred_element_type=jnp.float32)         # (TB, NUM_CLASSES)
    o_ref[...] = (logits + b_ref[...].astype(jnp.float32)).astype(o_ref.dtype)


def _pick_tb(n, hw, c, itemsize, requested):
    """Batch tile: multiple of 8 (sublane), >=2 grid steps when possible, VMEM-budgeted."""
    tb = max(8, (int(requested) // 8) * 8)
    # Cap so the grid has at least 2 steps when the batch allows it (v7x megacore sharding).
    two_step_cap = max(8, (((n + 1) // 2) + 7) // 8 * 8)
    tb = min(tb, two_step_cap)
    # Keep the double-buffered feature tile within a conservative budget so it is safe even on
    # v7x (64 MiB physical / 32 MiB default scoped VMEM); v5e/v6e have more headroom.
    feature_budget = 26 << 20
    while tb > 8 and 2 * tb * hw * c * itemsize > feature_budget:
        tb -= 8
    return tb


def se101_head(feats_nhwc, weight, bias, *, tb=32):
    """Head on lane-dense features.

    feats_nhwc: (N, H, W, C) backbone features (f32 or bf16).
    weight:     (num_classes, C) torch nn.Linear weight (native torch layout, kept lane-dense).
    bias:       (num_classes,).
    Returns (N, num_classes) logits in float32 (matches the PyTorch head).
    """
    N, H, W, C = feats_nhwc.shape
    num_classes = weight.shape[0]
    hw = H * W
    itemsize = jnp.dtype(feats_nhwc.dtype).itemsize

    x = feats_nhwc.reshape(N, hw, C)          # row-major metadata reshape, no HBM copy
    b = bias.reshape(1, num_classes)

    tb = _pick_tb(N, hw, C, itemsize, tb)
    grid = (pl.cdiv(N, tb),)                  # ragged last block handled by masked boundary stores

    feat_tile_bytes = tb * hw * C * itemsize
    vmem_limit = int(min(max(2 * feat_tile_bytes + (8 << 20), 16 << 20), 64 << 20))

    cost = pl.CostEstimate(
        flops=N * hw * C + 2 * N * C * num_classes,
        transcendentals=0,
        bytes_accessed=(x.size * itemsize
                        + weight.size * jnp.dtype(weight.dtype).itemsize
                        + bias.size * jnp.dtype(bias.dtype).itemsize
                        + N * num_classes * 4),
    )

    return pl.pallas_call(
        se101_head_kernel,
        out_shape=jax.ShapeDtypeStruct((N, num_classes), jnp.float32),
        grid_spec=pltpu.PrefetchScalarGridSpec(
            num_scalar_prefetch=0,
            grid=grid,
            in_specs=[
                pl.BlockSpec((tb, hw, C), lambda n: (n, 0, 0)),           # per-step feature tile
                pl.BlockSpec((num_classes, C), lambda n: (0, 0)),         # full weight, resident
                pl.BlockSpec((1, num_classes), lambda n: (0, 0)),         # bias, resident
            ],
            out_specs=pl.BlockSpec((tb, num_classes), lambda n: (n, 0)),  # per-step output block
        ),
        compiler_params=pltpu.CompilerParams(
            dimension_semantics=("parallel",),     # each step owns its output block -> megacore-safe
            vmem_limit_bytes=vmem_limit,
        ),
        cost_estimate=cost,
    )(x, weight, b)


def se101_head_nchw(feats_nchw, weight, bias, *, tb=32):
    """API-parity wrapper for the PyTorch NCHW backbone output.

    The NCHW->NHWC transpose is a full extra HBM read+write of the feature map; do NOT use in
    production — have the backbone emit NHWC (or fuse the pool into its epilogue) instead.
    """
    feats_nhwc = jnp.transpose(feats_nchw, (0, 2, 3, 1))
    return se101_head(feats_nhwc, weight, bias, tb=tb)


if __name__ == "__main__":
    key = jax.random.PRNGKey(0)
    k1, k2, k3, k4 = jax.random.split(key, 4)

    # Small stand-in shapes: the real se_resnext101 head sees (N, 7, 7, 2048) features.
    C, H, W = 256, 8, 8
    NUM_CLASSES = 5

    # Deterministic nn.Linear-style init: U(-1/sqrt(in_features), +1/sqrt(in_features)).
    bound = 1.0 / (C ** 0.5)
    weight = jax.random.uniform(k2, (NUM_CLASSES, C), minval=-bound, maxval=bound,
                                dtype=jnp.float32)
    bias = jax.random.uniform(k3, (NUM_CLASSES,), minval=-bound, maxval=bound,
                              dtype=jnp.float32)

    # Case 1: tiny batch (single partial grid block), f32 features.
    feats1 = jax.random.normal(k1, (2, H, W, C), dtype=jnp.float32)
    out1 = jax.block_until_ready(se101_head(feats1, weight, bias))
    ref1 = feats1.mean(axis=(1, 2)) @ weight.T + bias
    assert out1.shape == (2, NUM_CLASSES), out1.shape
    assert out1.dtype == jnp.float32
    assert jnp.allclose(out1, ref1, atol=1e-4, rtol=1e-4)

    # Case 2: multi-step grid with ragged last block (N % tb != 0), bf16 features, f32 logits.
    feats2 = jax.random.normal(k4, (20, H, W, C), dtype=jnp.bfloat16)
    out2 = jax.block_until_ready(se101_head(feats2, weight, bias))
    ref2 = feats2.astype(jnp.float32).mean(axis=(1, 2)) @ weight.T + bias
    assert out2.shape == (20, NUM_CLASSES), out2.shape
    assert out2.dtype == jnp.float32
    assert jnp.allclose(out2, ref2, atol=2e-2, rtol=2e-2)

    print("KERNEL_OK")
</pallas_src>

<mosaic_0001>
module attributes {stable_mosaic.version = 11 : i64} {
  func.func @se101_head_kernel(%arg0: i32, %arg1: memref<8x64x256xf32, #tpu.memory_space<vmem>>, %arg2: memref<5x256xf32, #tpu.memory_space<vmem>>, %arg3: memref<1x5xf32, #tpu.memory_space<vmem>>, %arg4: memref<8x5xf32, #tpu.memory_space<vmem>>) attributes {dimension_semantics = [#tpu.dimension_semantics<parallel>], iteration_bounds = array<i64: 1>, scalar_prefetch = 0 : i64, scratch_operands = 0 : i64, tpu.core_type = #tpu.core_type<tc>, window_params = [{transform_indices = @transform_0, window_bounds = array<i64: 8, 64, 256>}, {pipeline_mode = #tpu.pipeline_mode<synchronous>, transform_indices = @transform_1, window_bounds = array<i64: 5, 256>}, {pipeline_mode = #tpu.pipeline_mode<synchronous>, transform_indices = @transform_2, window_bounds = array<i64: 1, 5>}, {transform_indices = @transform_3, window_bounds = array<i64: 8, 5>}]} {
    %c0 = arith.constant 0 : index
    %c0_0 = arith.constant 0 : index
    %c0_1 = arith.constant 0 : index
    %0 = vector.load %arg1[%c0, %c0_0, %c0_1] : memref<8x64x256xf32, #tpu.memory_space<vmem>>, vector<8x64x256xf32>
    %cst = arith.constant dense<0.000000e+00> : vector<8x256xf32>
    %1 = vector.multi_reduction <add>, %0, %cst [1] : vector<8x64x256xf32> to vector<8x256xf32>
    %cst_2 = arith.constant 6.400000e+01 : f32
    %2 = vector.broadcast %cst_2 : f32 to vector<8x256xf32>
    %3 = arith.divf %1, %2 : vector<8x256xf32>
    %c0_3 = arith.constant 0 : index
    %c0_4 = arith.constant 0 : index
    %4 = vector.load %arg2[%c0_3, %c0_4] : memref<5x256xf32, #tpu.memory_space<vmem>>, vector<5x256xf32>
    %cst_5 = arith.constant dense<0.000000e+00> : vector<8x5xf32>
    %5 = tpu.matmul %3, %4, %cst_5 {dimension_numbers = #tpu.dot_dimension_numbers<[1], [1], [0], [0], [0, 0, 1, 0], [], []>} : vector<8x256xf32>, vector<5x256xf32>, vector<8x5xf32> -> vector<8x5xf32>
    %c0_6 = arith.constant 0 : index
    %c0_7 = arith.constant 0 : index
    %6 = vector.load %arg3[%c0_6, %c0_7] : memref<1x5xf32, #tpu.memory_space<vmem>>, vector<1x5xf32>
    %7 = vector.broadcast %6 : vector<1x5xf32> to vector<8x5xf32>
    %8 = arith.addf %5, %7 : vector<8x5xf32>
    %c0_8 = arith.constant 0 : index
    %c0_9 = arith.constant 0 : index
    %9 = vector.load %arg4[%c0_8, %c0_9] : memref<8x5xf32, #tpu.memory_space<vmem>>, vector<8x5xf32>
    tpu.vector_store %arg4[%c0_8, %c0_9], %8 {strides = array<i32>} : memref<8x5xf32, #tpu.memory_space<vmem>>, vector<8x5xf32>,
    return
  }
  func.func @transform_0(%arg0: i32) -> (i32, i32, i32) {
    %c0_i32 = arith.constant 0 : i32
    %c0_i32_0 = arith.constant 0 : i32
    %c0_i32_1 = arith.constant 0 : i32
    return %arg0, %c0_i32, %c0_i32_0 : i32, i32, i32
  }
  func.func @transform_1(%arg0: i32) -> (i32, i32) {
    %c0_i32 = arith.constant 0 : i32
    %c0_i32_0 = arith.constant 0 : i32
    %c0_i32_1 = arith.constant 0 : i32
    return %c0_i32, %c0_i32_0 : i32, i32
  }
  func.func @transform_2(%arg0: i32) -> (i32, i32) {
    %c0_i32 = arith.constant 0 : i32
    %c0_i32_0 = arith.constant 0 : i32
    %c0_i32_1 = arith.constant 0 : i32
    return %c0_i32, %c0_i32_0 : i32, i32
  }
  func.func @transform_3(%arg0: i32) -> (i32, i32) {
    %c0_i32 = arith.constant 0 : i32
    %c0_i32_0 = arith.constant 0 : i32
    return %arg0, %c0_i32 : i32, i32
  }
}

</mosaic_0001>

<bundles_post_ra>
// kernel: tpu_custom_call.1
= control target key start
LH: loop header
LB: loop body
LE: loop exit
PB: predicated region body
PF: predicated region fallthrough
CT: control target
= control target key end

     0   :  { %8 = vsyncpa [#allocation3], 0  ;;  %s692_s0 = inlined_call_operand.hbm [shape: f32[2,64,256], index: 0, kind: input, shape index: {}]   ;;  %s693_s1 = inlined_call_operand.hbm [shape: f32[5,256], index: 1, kind: input, shape index: {}]   ;;  %s694_s2 = inlined_call_operand.vmem [shape: f32[1,5], index: 2, kind: input, shape index: {}]   ;;  %s695_s3 = inlined_call_operand.hbm [shape: f32[2,5], index: 3, kind: output, shape index: {}]  }
   0x1   :  { %9 = vsyncpa [#allocation6], 0 }
   0x2   :  { %10 = vsyncpa [#allocation4], 0 }
   0x3   :  { %15 = vsyncadd [#allocation3], 12288  ;;  %s612_s12 = smov [#allocation2]   ;;  %s540_s16 = scalar_lea.hbm %s692_s0, 4096 }
   0x4   :  { %s16_s13 = sshll.u32 %s612_s12, 4  ;;  %p541_p0 = scmp.ne.s32.totalorder %s692_s0, %s540_s16  ;;  %s17_s13 = int_to_ptr.vmem [resolvable:$true] %s16_s13 }
   0x5   :  { %p544_p1 = scmp.lt.u32.totalorder %s540_s16, %s692_s0 }
   0x7   :  { %p546_p2 = pnand %p544_p1, %p541_p0 }
   0x9   :  { %549 = shalt.err (!%p546_p2)
}
   0xa   :  { %s550_s21 = scalar_lea.vmem %s17_s13, 4096  ;;  %s554_s22 = scalar_lea.vmem %s17_s13, 16384 }
   0xb   :  { %p551_p3 = scmp.ne.s32.totalorder %s17_s13, %s550_s21  ;;  %p555_p4 = scmp.lt.s32.totalorder %s17_s13, %s17_s13 }
   0xc   :  { %p556_p5 = scmp.lt.s32.totalorder %s554_s22, %s550_s21 }
   0xe   :  { %p557_p6 = por %p556_p5, %p555_p4 }
  0x10   :  { %p558_p7 = pnand %p557_p6, %p551_p3 }
  0x12   :  { %561 = shalt.err (!%p558_p7)
}
  0x13   :  { %s613_s23 = smov 256   ;;  %s614_s24 = smov 16  }
  0x14   :  { %22 = dma.hbm_to_vmem [thread:$0]  %s692_s0, 4096, %s17_s13, [#allocation3], %s613_s23, %s613_s23, %s614_s24  }
  0x15   :  { %s615_s27 = smov [#allocation5]   ;;  %s562_s4 = scalar_lea.hbm %s693_s1, 256 }
  0x16   :  { %s29_s28 = sshll.u32 %s615_s27, 4  ;;  %p563_p8 = scmp.ne.s32.totalorder %s693_s1, %s562_s4  ;;  %s30_s28 = int_to_ptr.vmem [resolvable:$true] %s29_s28 }
  0x17   :  { %p566_p9 = scmp.lt.u32.totalorder %s562_s4, %s693_s1 }
  0x19   :  { %p568_p10 = pnand %p566_p9, %p563_p8 }
  0x1b   :  { %571 = shalt.err (!%p568_p10)
}
  0x1c   :  { %s572_s9 = scalar_lea.vmem %s30_s28, 256  ;;  %p577_p12 = scmp.lt.s32.totalorder %s30_s28, %s30_s28 }
  0x1d   :  { %p573_p11 = scmp.ne.s32.totalorder %s30_s28, %s572_s9  ;;  %p578_p13 = scmp.lt.s32.totalorder %s572_s9, %s572_s9 }
  0x1f   :  { %p579_p0 = por %p578_p13, %p577_p12 }
  0x21   :  { %p580_p1 = pnand %p579_p0, %p573_p11 }
  0x23   :  { %583 = shalt.err (!%p580_p1)
}
  0x24   :  { %32 = dma.hbm_to_vmem [thread:$0]  %s693_s1, 256, %s30_s28, [#allocation6]  }
  0x25   :  { %606 = dma.done.wait [#allocation3], 16384  }
  0x26   :  { %607 = vsyncadd [#allocation3], 4294950912 }
  0x27   :  { %608 = dma.done.wait [#allocation6], 256  }
  0x28   :  { %609 = vsyncadd [#allocation6], 4294967040  ;;  %v395_v0 = vld [vmem:[#allocation5 + $0x8] sm:$0x1f]  ;;  %v394_v1 = vld [vmem:[#allocation5] sm:$0x1f] }
  0x29   :  { %v42_v2 = vld [vmem:[#allocation2 + $0x8] sm:$0xff]  ;;  %442 = vmatprep.subr.mxu0 %v395_v0  ;;  %v44_v3 = vld [vmem:[#allocation2 + $0x18] sm:$0xff]  ;;  %vm419_vm0 = vcmask 1041409   ;;  %vm421_vm1 = vcmask 1042434   ;;  %vm423_vm2 = vcmask 1043459   ;;  %vm425_vm3 = vcmask 1044484  }
  0x2a   :  { %v46_v4 = vld [vmem:[#allocation2 + $0x28] sm:$0xff]  ;;  %443 = vmatpush1.xpose.msra.mxu0 %v394_v1  ;;  %v182_v5 = vadd.f32 %v44_v3, %v42_v2  ;;  %v48_v6 = vld [vmem:[#allocation2 + $0x38] sm:$0xff]  ;;  %vm427_vm4 = vcmask 1045509   ;;  %vm429_vm5 = vcmask 1046534   ;;  %vm431_vm6 = vcmask 1047559  }
  0x2b   :  { %v58_v7 = vld [vmem:[#allocation2 + $0x88] sm:$0xff]  ;;  %v60_v8 = vld [vmem:[#allocation2 + $0x98] sm:$0xff]  ;;  %vm512_vm7 = vcmask 39936  }
  0x2c   :  { %v62_v9 = vld [vmem:[#allocation2 + $0xa8] sm:$0xff]  ;;  %v183_v10 = vadd.f32 %v182_v5, %v46_v4  ;;  %v208_v11 = vadd.f32 %v60_v8, %v58_v7  ;;  %v64_v13 = vld [vmem:[#allocation2 + $0xb8] sm:$0xff] }
  0x2d   :  { %v50_v12 = vld [vmem:[#allocation2 + $0x48] sm:$0xff]  ;;  %v76_v15 = vld [vmem:[#allocation2 + $0x118] sm:$0xff] }
  0x2e   :  { %v74_v14 = vld [vmem:[#allocation2 + $0x108] sm:$0xff]  ;;  %v184_v17 = vadd.f32 %v183_v10, %v48_v6  ;;  %v209_v18 = vadd.f32 %v208_v11, %v62_v9  ;;  %v52_v19 = vld [vmem:[#allocation2 + $0x58] sm:$0xff] }
  0x2f   :  { %v78_v16 = vld [vmem:[#allocation2 + $0x128] sm:$0xff]  ;;  %v234_v21 = vadd.f32 %v76_v15, %v74_v14  ;;  %v80_v23 = vld [vmem:[#allocation2 + $0x138] sm:$0xff] }
  0x30   :  { %v66_v20 = vld [vmem:[#allocation2 + $0xc8] sm:$0xff]  ;;  %v185_v25 = vadd.f32 %v184_v17, %v50_v12  ;;  %v210_v26 = vadd.f32 %v209_v18, %v64_v13  ;;  %v68_v27 = vld [vmem:[#allocation2 + $0xd8] sm:$0xff] }
  0x31   :  { %v54_v22 = vld [vmem:[#allocation2 + $0x68] sm:$0xff]  ;;  %v92_v28 = vld [vmem:[#allocation2 + $0x198] sm:$0xff]  ;;  %v235_v30 = vadd.f32 %v234_v21, %v78_v16 }
  0x32   :  { %v90_v24 = vld [vmem:[#allocation2 + $0x188] sm:$0xff]  ;;  %v56_v31 = vld [vmem:[#allocation2 + $0x78] sm:$0xff]  ;;  %v186_v34 = vadd.f32 %v185_v25, %v52_v19  ;;  %v211_v35 = vadd.f32 %v210_v26, %v66_v20 }
  0x33   :  { %v94_v29 = vld [vmem:[#allocation2 + $0x1a8] sm:$0xff]  ;;  %v260_v36 = vadd.f32 %v92_v28, %v90_v24  ;;  %v96_v37 = vld [vmem:[#allocation2 + $0x1b8] sm:$0xff]  ;;  %v236_v40 = vadd.f32 %v235_v30, %v80_v23 }
  0x34   :  { %v70_v32 = vld [vmem:[#allocation2 + $0xe8] sm:$0xff]  ;;  %v108_v39 = vld [vmem:[#allocation2 + $0x218] sm:$0xff]  ;;  %v187_v44 = vadd.f32 %v186_v34, %v54_v22  ;;  %v212_v45 = vadd.f32 %v211_v35, %v68_v27 }
  0x35   :  { %v82_v33 = vld [vmem:[#allocation2 + $0x148] sm:$0xff]  ;;  %v72_v41 = vld [vmem:[#allocation2 + $0xf8] sm:$0xff]  ;;  %v261_v46 = vadd.f32 %v260_v36, %v94_v29 }
  0x36   :  { %v106_v38 = vld [vmem:[#allocation2 + $0x208] sm:$0xff]  ;;  %v84_v42 = vld [vmem:[#allocation2 + $0x158] sm:$0xff]  ;;  %v237_v51 = vadd.f32 %v236_v40, %v82_v33  ;;  %v188_v55 = vadd.f32 %v187_v44, %v56_v31  ;;  %v213_v56 = vadd.f32 %v212_v45, %v70_v32 }
  0x37   :  { %v110_v43 = vld [vmem:[#allocation2 + $0x228] sm:$0xff]  ;;  %v286_v47 = vadd.f32 %v108_v39, %v106_v38  ;;  %v112_v50 = vld [vmem:[#allocation2 + $0x238] sm:$0xff]  ;;  %v262_v57 = vadd.f32 %v261_v46, %v96_v37 }
  0x38   :  { %v86_v48 = vld [vmem:[#allocation2 + $0x168] sm:$0xff]  ;;  %v124_v53 = vld [vmem:[#allocation2 + $0x298] sm:$0xff]  ;;  %v238_v61 = vadd.f32 %v237_v51, %v84_v42  ;;  %v189_v2 = vrot.slane %v188_v55, 4  ;;  %v214_v3 = vadd.f32 %v213_v56, %v72_v41 }
  0x39   :  { %v98_v49 = vld [vmem:[#allocation2 + $0x1c8] sm:$0xff]  ;;  %v287_v58 = vadd.f32 %v286_v47, %v110_v43  ;;  %v100_v59 = vld [vmem:[#allocation2 + $0x1d8] sm:$0xff] }
  0x3a   :  { %v122_v52 = vld [vmem:[#allocation2 + $0x288] sm:$0xff]  ;;  %v88_v63 = vld [vmem:[#allocation2 + $0x178] sm:$0xff]  ;;  %v263_v4 = vadd.f32 %v262_v57, %v98_v49  ;;  %v239_v9 = vadd.f32 %v238_v61, %v86_v48  ;;  %v190_v14 = vadd.f32 %v189_v2, %v188_v55  ;;  %v215_v15 = vrot.slane %v214_v3, 4 }
  0x3b   :  { %v126_v54 = vld [vmem:[#allocation2 + $0x2a8] sm:$0xff]  ;;  %v312_v62 = vadd.f32 %v124_v53, %v122_v52  ;;  %v128_v0 = vld [vmem:[#allocation2 + $0x2b8] sm:$0xff]  ;;  %v288_v5 = vadd.f32 %v287_v58, %v112_v50 }
  0x3c   :  { %v114_v60 = vld [vmem:[#allocation2 + $0x248] sm:$0xff]  ;;  %v116_v7 = vld [vmem:[#allocation2 + $0x258] sm:$0xff]  ;;  %v264_v16 = vadd.f32 %v263_v4, %v100_v59  ;;  %v240_v21 = vadd.f32 %v239_v9, %v88_v63  ;;  %v191_v27 = vrot.slane %v190_v14, 2  ;;  %v216_v28 = vadd.f32 %v215_v15, %v214_v3  ;;  %v41_v4 = vld [vmem:[#allocation2] sm:$0xff] }
  0x3d   :  { %v138_v1 = vld [vmem:[#allocation2 + $0x308] sm:$0xff]  ;;  %v140_v8 = vld [vmem:[#allocation2 + $0x318] sm:$0xff]  ;;  %v313_v10 = vadd.f32 %v312_v62, %v126_v54  ;;  %v289_v17 = vadd.f32 %v288_v5, %v114_v60  ;;  %v43_v5 = vld [vmem:[#allocation2 + $0x10] sm:$0xff] }
  0x3e   :  { %v102_v6 = vld [vmem:[#allocation2 + $0x1e8] sm:$0xff]  ;;  %v104_v11 = vld [vmem:[#allocation2 + $0x1f8] sm:$0xff]  ;;  %v338_v23 = vadd.f32 %v140_v8, %v138_v1  ;;  %v241_v32 = vrot.slane %v240_v21, 4  ;;  %v192_v39 = vadd.f32 %v191_v27, %v190_v14  ;;  %v217_v40 = vrot.slane %v216_v28, 2  ;;  %v57_v27 = vld [vmem:[#allocation2 + $0x80] sm:$0xff] }
  0x3f   :  { %v130_v12 = vld [vmem:[#allocation2 + $0x2c8] sm:$0xff]  ;;  %v156_v20 = vld [vmem:[#allocation2 + $0x398] sm:$0xff]  ;;  %v314_v22 = vadd.f32 %v313_v10, %v128_v0  ;;  %v265_v29 = vadd.f32 %v264_v16, %v102_v6  ;;  %v290_v30 = vadd.f32 %v289_v17, %v116_v7  ;;  %v45_v16 = vld [vmem:[#allocation2 + $0x20] sm:$0xff] }
  0x40   :  { %v142_v13 = vld [vmem:[#allocation2 + $0x328] sm:$0xff]  ;;  %v132_v24 = vld [vmem:[#allocation2 + $0x2d8] sm:$0xff]  ;;  %v242_v43 = vadd.f32 %v241_v32, %v240_v21  ;;  %v193_v50 = vrot.slane %v192_v39, 1  ;;  %v218_v51 = vadd.f32 %v217_v40, %v216_v28  ;;  %v169_v21 = vadd.f32 %v43_v5, %v41_v4  ;;  %v59_v28 = vld [vmem:[#allocation2 + $0x90] sm:$0xff] }
  0x41   :  { %v118_v18 = vld [vmem:[#allocation2 + $0x268] sm:$0xff]  ;;  %v144_v25 = vld [vmem:[#allocation2 + $0x338] sm:$0xff]  ;;  %v315_v33 = vadd.f32 %v314_v22, %v130_v12  ;;  %v339_v34 = vadd.f32 %v338_v23, %v142_v13  ;;  %v266_v41 = vadd.f32 %v265_v29, %v104_v11  ;;  %v79_v4 = vld [vmem:[#allocation2 + $0x130] sm:$0xff] }
  0x42   :  { %v154_v19 = vld [vmem:[#allocation2 + $0x388] sm:$0xff]  ;;  %v120_v31 = vld [vmem:[#allocation2 + $0x278] sm:$0xff]  ;;  %v291_v42 = vadd.f32 %v290_v30, %v118_v18  ;;  %v243_v54 = vrot.slane %v242_v43, 2  ;;  %v194_v60 = vadd.f32 %v193_v50, %v192_v39  ;;  %v219_v61 = vrot.slane %v218_v51, 1  ;;  %v63_v50 = vld [vmem:[#allocation2 + $0xb0] sm:$0xff] }
  0x43   :  { %v158_v26 = vld [vmem:[#allocation2 + $0x3a8] sm:$0xff]  ;;  %v364_v35 = vadd.f32 %v156_v20, %v154_v19  ;;  %v160_v38 = vld [vmem:[#allocation2 + $0x3b8] sm:$0xff]  ;;  %v316_v44 = vadd.f32 %v315_v33, %v132_v24  ;;  %v340_v45 = vadd.f32 %v339_v34, %v144_v25  ;;  %v267_v52 = vrot.slane %v266_v41, 4 }
  0x44   :  { %v134_v36 = vld [vmem:[#allocation2 + $0x2e8] sm:$0xff]  ;;  %v136_v47 = vld [vmem:[#allocation2 + $0x2f8] sm:$0xff]  ;;  %v292_v53 = vadd.f32 %v291_v42, %v120_v31  ;;  %v244_v0 = vadd.f32 %v243_v54, %v242_v43  ;;  %v220_v8 = vadd.f32 %v219_v61, %v218_v51  ;;  %v379_v11 = vmul.f32 0.015625, %v194_v60  ;;  %v75_v42 = vld [vmem:[#allocation2 + $0x110] sm:$0xff] }
  0x45   :  { %v146_v37 = vld [vmem:[#allocation2 + $0x348] sm:$0xff]  ;;  %v365_v46 = vadd.f32 %v364_v35, %v158_v26  ;;  %v148_v48 = vld [vmem:[#allocation2 + $0x358] sm:$0xff]  ;;  %v317_v55 = vadd.f32 %v316_v44, %v134_v36  ;;  %v268_v62 = vadd.f32 %v267_v52, %v266_v41  ;;  %v47_v26 = vld [vmem:[#allocation2 + $0x30] sm:$0xff]  ;;  %v170_v32 = vadd.f32 %v169_v21, %v45_v16 }
  0x46   :  { %v162_v49 = vld [vmem:[#allocation2 + $0x3c8] sm:$0xff]  ;;  %v341_v56 = vadd.f32 %v340_v45, %v146_v37  ;;  %v164_v59 = vld [vmem:[#allocation2 + $0x3d8] sm:$0xff]  ;;  %v293_v63 = vrot.slane %v292_v53, 4  ;;  %v245_v12 = vrot.slane %v244_v0, 1  ;;  %v381_v20 = vmul.f32 0.015625, %v220_v8  ;;  %v49_v37 = vld [vmem:[#allocation2 + $0x40] sm:$0xff] }
  0x47   :  { %v366_v57 = vadd.f32 %v365_v46, %v160_v38  ;;  %v150_v58 = vld [vmem:[#allocation2 + $0x368] sm:$0xff]  ;;  %v318_v1 = vadd.f32 %v317_v55, %v136_v47  ;;  %v152_v6 = vld [vmem:[#allocation2 + $0x378] sm:$0xff]  ;;  %v269_v9 = vrot.slane %v268_v62, 2  ;;  %v61_v38 = vld [vmem:[#allocation2 + $0xa0] sm:$0xff]  ;;  %v171_v43 = vadd.f32 %v170_v32, %v47_v26 }
  0x48   :  { %v342_v2 = vadd.f32 %v341_v56, %v148_v48  ;;  %v166_v7 = vld [vmem:[#allocation2 + $0x3e8] sm:$0xff]  ;;  %v294_v10 = vadd.f32 %v293_v63, %v292_v53  ;;  %v168_v17 = vld [vmem:[#allocation2 + $0x3f8] sm:$0xff]  ;;  %v246_v22 = vadd.f32 %v245_v12, %v244_v0  ;;  %v433_v31 = vsel %vm419_vm0, %v381_v20, %v379_v11  ;;  %v73_v41 = vld [vmem:[#allocation2 + $0x100] sm:$0xff] }
  0x49   :  { %v367_v3 = vadd.f32 %v366_v57, %v162_v49  ;;  %v319_v13 = vrot.slane %v318_v1, 4  ;;  %v270_v18 = vadd.f32 %v269_v9, %v268_v62  ;;  %v195_v44 = vadd.f32 %v59_v28, %v57_v27  ;;  %v51_v49 = vld [vmem:[#allocation2 + $0x50] sm:$0xff]  ;;  %v53_v53 = vld [vmem:[#allocation2 + $0x60] sm:$0xff] }
  0x4a   :  { %v343_v14 = vadd.f32 %v342_v2, %v150_v58  ;;  %v295_v19 = vrot.slane %v294_v10, 2  ;;  %v383_v36 = vmul.f32 0.015625, %v246_v22  ;;  %v77_v54 = vld [vmem:[#allocation2 + $0x120] sm:$0xff]  ;;  %v172_v55 = vadd.f32 %v171_v43, %v49_v37  ;;  %v91_v62 = vld [vmem:[#allocation2 + $0x190] sm:$0xff] }
  0x4b   :  { %v368_v15 = vadd.f32 %v367_v3, %v164_v59  ;;  %v320_v23 = vadd.f32 %v319_v13, %v318_v1  ;;  %v271_v29 = vrot.slane %v270_v18, 1  ;;  %v196_v56 = vadd.f32 %v195_v44, %v61_v38  ;;  %v65_v60 = vld [vmem:[#allocation2 + $0xc0] sm:$0xff]  ;;  %v55_v2 = vld [vmem:[#allocation2 + $0x70] sm:$0xff] }
  0x4c   :  { %v344_v24 = vadd.f32 %v343_v14, %v152_v6  ;;  %v296_v30 = vadd.f32 %v295_v19, %v294_v10  ;;  %v434_v48 = vsel %vm421_vm1, %v383_v36, %v433_v31  ;;  %v89_v61 = vld [vmem:[#allocation2 + $0x180] sm:$0xff]  ;;  %v221_v63 = vadd.f32 %v75_v42, %v73_v41  ;;  %v67_v3 = vld [vmem:[#allocation2 + $0xd0] sm:$0xff] }
  0x4d   :  { %v369_v25 = vadd.f32 %v368_v15, %v166_v7  ;;  %v321_v33 = vrot.slane %v320_v23, 2  ;;  %v272_v39 = vadd.f32 %v271_v29, %v270_v18  ;;  %v173_v5 = vadd.f32 %v172_v55, %v51_v49  ;;  %v93_v10 = vld [vmem:[#allocation2 + $0x1a0] sm:$0xff]  ;;  %v107_v12 = vld [vmem:[#allocation2 + $0x210] sm:$0xff] }
  0x4e   :  { %v345_v34 = vrot.slane %v344_v24, 4  ;;  %v297_v40 = vrot.slane %v296_v30, 1  ;;  %v197_v6 = vadd.f32 %v196_v56, %v63_v50  ;;  %v105_v11 = vld [vmem:[#allocation2 + $0x200] sm:$0xff]  ;;  %v222_v13 = vadd.f32 %v221_v63, %v77_v54  ;;  %v83_v26 = vld [vmem:[#allocation2 + $0x150] sm:$0xff] }
  0x4f   :  { %v370_v35 = vadd.f32 %v369_v25, %v168_v17  ;;  %v322_v45 = vadd.f32 %v321_v33, %v320_v23  ;;  %v385_v52 = vmul.f32 0.015625, %v272_v39  ;;  %v81_v15 = vld [vmem:[#allocation2 + $0x140] sm:$0xff]  ;;  %v174_v16 = vadd.f32 %v173_v5, %v53_v53  ;;  %v95_v23 = vld [vmem:[#allocation2 + $0x1b0] sm:$0xff] }
  0x50   :  { %v346_v46 = vadd.f32 %v345_v34, %v344_v24  ;;  %v298_v51 = vadd.f32 %v297_v40, %v296_v30  ;;  %v198_v17 = vadd.f32 %v197_v6, %v65_v60  ;;  %v247_v18 = vadd.f32 %v91_v62, %v89_v61  ;;  %v69_v22 = vld [vmem:[#allocation2 + $0xe0] sm:$0xff]  ;;  %v123_v28 = vld [vmem:[#allocation2 + $0x290] sm:$0xff] }
  0x51   :  { %v371_v47 = vrot.slane %v370_v35, 4  ;;  %v323_v57 = vrot.slane %v322_v45, 1  ;;  %v435_v1 = vsel %vm423_vm2, %v385_v52, %v434_v48  ;;  %v109_v24 = vld [vmem:[#allocation2 + $0x220] sm:$0xff]  ;;  %v223_v25 = vadd.f32 %v222_v13, %v79_v4  ;;  %v71_v36 = vld [vmem:[#allocation2 + $0xf0] sm:$0xff] }
  0x52   :  { %v347_v58 = vrot.slane %v346_v46, 2  ;;  %v387_v0 = vmul.f32 0.015625, %v298_v51  ;;  %v121_v27 = vld [vmem:[#allocation2 + $0x280] sm:$0xff]  ;;  %v175_v29 = vadd.f32 %v174_v16, %v55_v2  ;;  %v199_v30 = vadd.f32 %v198_v17, %v67_v3  ;;  %v111_v38 = vld [vmem:[#allocation2 + $0x230] sm:$0xff] }
  0x53   :  { %v372_v59 = vadd.f32 %v371_v47, %v370_v35  ;;  %v324_v7 = vadd.f32 %v323_v57, %v322_v45  ;;  %v248_v31 = vadd.f32 %v247_v18, %v93_v10  ;;  %v273_v32 = vadd.f32 %v107_v12, %v105_v11  ;;  %v97_v37 = vld [vmem:[#allocation2 + $0x1c0] sm:$0xff]  ;;  %v87_v48 = vld [vmem:[#allocation2 + $0x170] sm:$0xff] }
  0x54   :  { %v348_v8 = vadd.f32 %v347_v58, %v346_v46  ;;  %v436_v14 = vsel %vm425_vm3, %v387_v0, %v435_v1  ;;  %v224_v39 = vadd.f32 %v223_v25, %v81_v15  ;;  %v85_v40 = vld [vmem:[#allocation2 + $0x160] sm:$0xff]  ;;  %v176_v42 = vrot.slane %v175_v29, 4  ;;  %v99_v49 = vld [vmem:[#allocation2 + $0x1d0] sm:$0xff] }
  0x55   :  { %v373_v9 = vrot.slane %v372_v59, 2  ;;  %v389_v21 = vmul.f32 0.015625, %v324_v7  ;;  %v125_v41 = vld [vmem:[#allocation2 + $0x2a0] sm:$0xff]  ;;  %v200_v43 = vadd.f32 %v199_v30, %v69_v22  ;;  %v249_v44 = vadd.f32 %v248_v31, %v95_v23  ;;  %v127_v53 = vld [vmem:[#allocation2 + $0x2b0] sm:$0xff] }
  0x56   :  { %v349_v19 = vrot.slane %v348_v8, 1  ;;  %v274_v45 = vadd.f32 %v273_v32, %v109_v24  ;;  %v113_v50 = vld [vmem:[#allocation2 + $0x240] sm:$0xff]  ;;  %v225_v51 = vadd.f32 %v224_v39, %v83_v26  ;;  %v299_v52 = vadd.f32 %v123_v28, %v121_v27  ;;  %v139_v55 = vld [vmem:[#allocation2 + $0x310] sm:$0xff] }
  0x57   :  { %v374_v20 = vadd.f32 %v373_v9, %v372_v59  ;;  %v437_v35 = vsel %vm427_vm4, %v389_v21, %v436_v14  ;;  %v137_v54 = vld [vmem:[#allocation2 + $0x300] sm:$0xff]  ;;  %v177_v56 = vadd.f32 %v176_v42, %v175_v29  ;;  %v201_v57 = vadd.f32 %v200_v43, %v71_v36  ;;  %v115_v63 = vld [vmem:[#allocation2 + $0x250] sm:$0xff] }
  0x58   :  { %v350_v33 = vadd.f32 %v349_v19, %v348_v8  ;;  %v250_v58 = vadd.f32 %v249_v44, %v97_v37  ;;  %v275_v59 = vadd.f32 %v274_v45, %v111_v38  ;;  %v101_v62 = vld [vmem:[#allocation2 + $0x1e0] sm:$0xff]  ;;  %v226_v1 = vadd.f32 %v225_v51, %v85_v40  ;;  %v155_v5 = vld [vmem:[#allocation2 + $0x390] sm:$0xff] }
  0x59   :  { %v375_v34 = vrot.slane %v374_v20, 1  ;;  %v129_v0 = vld [vmem:[#allocation2 + $0x2c0] sm:$0xff]  ;;  %v300_v2 = vadd.f32 %v299_v52, %v125_v41  ;;  %v178_v6 = vrot.slane %v177_v56, 2  ;;  %v202_v7 = vrot.slane %v201_v57, 4  ;;  %v103_v11 = vld [vmem:[#allocation2 + $0x1f0] sm:$0xff] }
  0x5a   :  { %v391_v47 = vmul.f32 0.015625, %v350_v33  ;;  %v141_v3 = vld [vmem:[#allocation2 + $0x320] sm:$0xff]  ;;  %v251_v8 = vadd.f32 %v250_v58, %v99_v49  ;;  %v276_v9 = vadd.f32 %v275_v59, %v113_v50  ;;  %v227_v13 = vadd.f32 %v226_v1, %v87_v48  ;;  %v131_v16 = vld [vmem:[#allocation2 + $0x2d0] sm:$0xff] }
  0x5b   :  { %v376_v46 = vadd.f32 %v375_v34, %v374_v20  ;;  %v153_v4 = vld [vmem:[#allocation2 + $0x380] sm:$0xff]  ;;  %v301_v14 = vadd.f32 %v300_v2, %v127_v53  ;;  %v325_v15 = vadd.f32 %v139_v55, %v137_v54  ;;  %v143_v17 = vld [vmem:[#allocation2 + $0x330] sm:$0xff]  ;;  %v179_v19 = vadd.f32 %v178_v6, %v177_v56 }
  0x5c   :  { %v438_v61 = vsel %vm429_vm5, %v391_v47, %v437_v35  ;;  %v117_v12 = vld [vmem:[#allocation2 + $0x260] sm:$0xff]  ;;  %v203_v20 = vadd.f32 %v202_v7, %v201_v57  ;;  %v252_v21 = vadd.f32 %v251_v8, %v101_v62  ;;  %v277_v22 = vadd.f32 %v276_v9, %v115_v63  ;;  %v119_v23 = vld [vmem:[#allocation2 + $0x270] sm:$0xff] }
  0x5d   :  { %v393_v60 = vmul.f32 0.015625, %v376_v46  ;;  %v157_v18 = vld [vmem:[#allocation2 + $0x3a0] sm:$0xff]  ;;  %v228_v24 = vrot.slane %v227_v13, 4  ;;  %v302_v25 = vadd.f32 %v301_v14, %v129_v0  ;;  %v326_v26 = vadd.f32 %v325_v15, %v141_v3  ;;  %v159_v30 = vld [vmem:[#allocation2 + $0x3b0] sm:$0xff] }
  0x5e   :  { %v351_v27 = vadd.f32 %v155_v5, %v153_v4  ;;  %v133_v28 = vld [vmem:[#allocation2 + $0x2e0] sm:$0xff]  ;;  %v180_v31 = vrot.slane %v179_v19, 1  ;;  %v204_v32 = vrot.slane %v203_v20, 2  ;;  %v253_v33 = vadd.f32 %v252_v21, %v103_v11  ;;  %v135_v39 = vld [vmem:[#allocation2 + $0x2f0] sm:$0xff] }
  0x5f   :  { %v439_v10 = vsel %vm431_vm6, %v393_v60, %v438_v61  ;;  %v145_v29 = vld [vmem:[#allocation2 + $0x340] sm:$0xff]  ;;  %v278_v34 = vadd.f32 %v277_v22, %v117_v12  ;;  %v229_v35 = vadd.f32 %v228_v24, %v227_v13  ;;  %v303_v36 = vadd.f32 %v302_v25, %v131_v16  ;;  %v147_v40 = vld [vmem:[#allocation2 + $0x350] sm:$0xff] }
  0x60   :  { %506 = vmatprep.mubr.f32.mxu0 %v439_v10  ;;  %v327_v37 = vadd.f32 %v326_v26, %v143_v17  ;;  %v352_v38 = vadd.f32 %v351_v27, %v157_v18  ;;  %v161_v41 = vld [vmem:[#allocation2 + $0x3c0] sm:$0xff]  ;;  %v181_v42 = vadd.f32 %v180_v31, %v179_v19  ;;  %v205_v43 = vadd.f32 %v204_v32, %v203_v20  ;;  %v163_v51 = vld [vmem:[#allocation2 + $0x3d0] sm:$0xff] }
  0x61   :  { %v254_v44 = vrot.slane %v253_v33, 4  ;;  %v279_v45 = vadd.f32 %v278_v34, %v119_v23  ;;  %v230_v46 = vrot.slane %v229_v35, 2  ;;  %v304_v47 = vadd.f32 %v303_v36, %v133_v28  ;;  %v149_v50 = vld [vmem:[#allocation2 + $0x360] sm:$0xff]  ;;  %v151_v59 = vld [vmem:[#allocation2 + $0x370] sm:$0xff] }
  0x62   :  { %v328_v48 = vadd.f32 %v327_v37, %v145_v29  ;;  %v353_v49 = vadd.f32 %v352_v38, %v159_v30  ;;  %v206_v52 = vrot.slane %v205_v43, 1  ;;  %v165_v60 = vld [vmem:[#allocation2 + $0x3e0] sm:$0xff]  ;;  %v378_v0 = vmul.f32 0.015625, %v181_v42  ;;  %v167_v5 = vld [vmem:[#allocation2 + $0x3f0] sm:$0xff] }
  0x63   :  { %v255_v53 = vadd.f32 %v254_v44, %v253_v33  ;;  %v280_v54 = vrot.slane %v279_v45, 4  ;;  %v231_v55 = vadd.f32 %v230_v46, %v229_v35  ;;  %v305_v56 = vadd.f32 %v304_v47, %v135_v39 }
  0x64   :  { %v329_v57 = vadd.f32 %v328_v48, %v147_v40  ;;  %v354_v58 = vadd.f32 %v353_v49, %v161_v41  ;;  %v207_v61 = vadd.f32 %v206_v52, %v205_v43  ;;  %v532_v48 = vld [vmem:[%s694_s2] ss:$0 sm:$0xff] }
  0x65   :  { %v256_v62 = vrot.slane %v255_v53, 2  ;;  %v281_v63 = vadd.f32 %v280_v54, %v279_v45  ;;  %v232_v1 = vrot.slane %v231_v55, 1  ;;  %v306_v2 = vrot.slane %v305_v56, 4 }
  0x66   :  { %v330_v3 = vadd.f32 %v329_v57, %v149_v50  ;;  %v355_v4 = vadd.f32 %v354_v58, %v163_v51  ;;  %v380_v8 = vmul.f32 0.015625, %v207_v61 }
  0x67   :  { %v257_v6 = vadd.f32 %v256_v62, %v255_v53  ;;  %v282_v7 = vrot.slane %v281_v63, 2  ;;  %v233_v9 = vadd.f32 %v232_v1, %v231_v55  ;;  %v307_v10 = vadd.f32 %v306_v2, %v305_v56 }
  0x68   :  { %v331_v11 = vadd.f32 %v330_v3, %v151_v59  ;;  %v356_v12 = vadd.f32 %v355_v4, %v165_v60  ;;  %v420_v15 = vsel %vm419_vm0, %v380_v8, %v378_v0 }
  0x69   :  { %v258_v13 = vrot.slane %v257_v6, 1  ;;  %v283_v14 = vadd.f32 %v282_v7, %v281_v63  ;;  %v308_v16 = vrot.slane %v307_v10, 2  ;;  %v382_v19 = vmul.f32 0.015625, %v233_v9 }
  0x6a   :  { %v332_v17 = vrot.slane %v331_v11, 4  ;;  %v357_v18 = vadd.f32 %v356_v12, %v167_v5 }
  0x6b   :  { %v259_v20 = vadd.f32 %v258_v13, %v257_v6  ;;  %v284_v21 = vrot.slane %v283_v14, 1  ;;  %v309_v22 = vadd.f32 %v308_v16, %v307_v10  ;;  %v422_v25 = vsel %vm421_vm1, %v382_v19, %v420_v15 }
  0x6c   :  { %v333_v23 = vadd.f32 %v332_v17, %v331_v11  ;;  %v358_v24 = vrot.slane %v357_v18, 4 }
  0x6d   :  { %v285_v26 = vadd.f32 %v284_v21, %v283_v14  ;;  %v384_v27 = vmul.f32 0.015625, %v259_v20  ;;  %v310_v28 = vrot.slane %v309_v22, 1 }
  0x6e   :  { %v334_v29 = vrot.slane %v333_v23, 2  ;;  %v359_v30 = vadd.f32 %v358_v24, %v357_v18 }
  0x6f   :  { %v386_v31 = vmul.f32 0.015625, %v285_v26  ;;  %v424_v32 = vsel %vm423_vm2, %v384_v27, %v422_v25  ;;  %v311_v33 = vadd.f32 %v310_v28, %v309_v22 }
  0x70   :  { %v335_v34 = vadd.f32 %v334_v29, %v333_v23  ;;  %v360_v35 = vrot.slane %v359_v30, 2 }
  0x71   :  { %v388_v38 = vmul.f32 0.015625, %v311_v33  ;;  %v426_v39 = vsel %vm425_vm3, %v386_v31, %v424_v32 }
  0x72   :  { %v336_v36 = vrot.slane %v335_v34, 1  ;;  %v361_v37 = vadd.f32 %v360_v35, %v359_v30 }
  0x73   :  { %v428_v42 = vsel %vm427_vm4, %v388_v38, %v426_v39 }
  0x74   :  { %v337_v40 = vadd.f32 %v336_v36, %v335_v34  ;;  %v362_v41 = vrot.slane %v361_v37, 1 }
  0x76   :  { %v363_v43 = vadd.f32 %v362_v41, %v361_v37  ;;  %v390_v44 = vmul.f32 0.015625, %v337_v40 }
  0x78   :  { %v392_v45 = vmul.f32 0.015625, %v363_v43  ;;  %v430_v46 = vsel %vm429_vm5, %v390_v44, %v428_v42 }
  0x7a   :  { %v432_v47 = vsel %vm431_vm6, %v392_v45, %v430_v46 }
  0x7b   :  { %507 = vmatmul.mubr.f32.vlgmr.msra.gmra.mrb[0].mxu0 %v432_v47 }
 0x14e   :  { %v508_v49 = vpop.f32.mrb[0].mxu0 }
 0x14f   :  { %v509_v50 = vadd.f32 %v532_v48, %v508_v49  ;;  %v510_v51 = vpop.f32.mrb[1].mxu0 }
 0x151   :  { %513 = vst.msk [vmem:[#allocation7] sm:$0xff] %vm512_vm7, %v509_v50 }
 0x152   :  { %518 = vsyncadd [#allocation4], 96  ;;  %s616_s12 = smov [#allocation7]  }
 0x153   :  { %s519_s13 = sshll.u32 %s616_s12, 4  ;;  %s520_s13 = int_to_ptr.vmem [resolvable:$true] %s519_s13 }
 0x154   :  { %s584_s14 = scalar_lea.vmem %s520_s13, 32  ;;  %s588_s15 = scalar_lea.vmem %s520_s13, 128 }
 0x155   :  { %p585_p2 = scmp.ne.s32.totalorder %s520_s13, %s584_s14  ;;  %p589_p3 = scmp.lt.s32.totalorder %s520_s13, %s520_s13 }
 0x156   :  { %p590_p4 = scmp.lt.s32.totalorder %s588_s15, %s584_s14 }
 0x158   :  { %p591_p5 = por %p590_p4, %p589_p3 }
 0x15a   :  { %p592_p6 = pnand %p591_p5, %p585_p2 }
 0x15c   :  { %595 = shalt.err (!%p592_p6)
}
 0x15d   :  { %s596_s2 = scalar_lea.hbm %s695_s3, 32 }
 0x15e   :  { %p597_p7 = scmp.ne.s32.totalorder %s695_s3, %s596_s2  ;;  %p600_p8 = scmp.lt.u32.totalorder %s596_s2, %s695_s3 }
 0x160   :  { %p602_p9 = pnand %p600_p8, %p597_p7 }
 0x162   :  { %605 = shalt.err (!%p602_p9)
}
 0x163   :  { %s617_s22 = smov 32   ;;  %s618_s23 = smov 2  }
 0x164   :  { %525 = dma.vmem_to_hbm [thread:$0]  %s520_s13, 32, %s695_s3, [#allocation4], %s617_s22, %s617_s22, %s618_s23  }
 0x165   :  { %610 = dma.done.wait [#allocation4], 128  }
 0x166   :  { %611 = vsyncadd [#allocation4], 4294967168 }
 0x167   :  { %529 = vsyncpa [#allocation3], 1 }
 0x168   :  { %530 = vsyncpa [#allocation6], 1 }
 0x169   :  { %531 = vsyncpa [#allocation4], 1 }

</bundles_post_ra>
